<compile_context>
chip_gen: v7x
topology: tpu7x:2x2x1
jax: 0.10.0
libtpu: 0.0.40
codegen_flags: <defaults>
</compile_context>

<pallas_src>
import math
import functools

import jax
import jax.numpy as jnp
from jax.experimental import pallas as pl
from jax.experimental.pallas import tpu as pltpu

LANE = 128


def _round_up(x, m):
    return (x + m - 1) // m * m


# ---------------------------------------------------------------------------
# Kernel
# ---------------------------------------------------------------------------
def _lstm_cell_kernel(z_ref, cx_ref, w_ref, b_ref, hy_ref, cy_ref):
    # One fused matmul: [x | hx] @ [Wx ; Wh]  -> (tb, 4*Hp), f32 accumulation on MXU.
    gates = jnp.dot(z_ref[...], w_ref[...], preferred_element_type=jnp.float32)
    gates = gates + b_ref[...].astype(jnp.float32)

    hp = hy_ref.shape[1]  # multiple of 128 -> all slices below are lane-dense
    ingate     = jax.nn.sigmoid(gates[:, 0 * hp:1 * hp])
    forgetgate = jax.nn.sigmoid(gates[:, 1 * hp:2 * hp])
    cellgate   = jnp.tanh(gates[:, 2 * hp:3 * hp])
    outgate    = jax.nn.sigmoid(gates[:, 3 * hp:4 * hp])

    cx = cx_ref[...].astype(jnp.float32)
    cy = cx * forgetgate + ingate * cellgate
    hy = outgate * jnp.tanh(cy)

    cy_ref[...] = cy.astype(cy_ref.dtype)       # lane-dense (tb, Hp) stores
    hy_ref[...] = hy.astype(hy_ref.dtype)


# ---------------------------------------------------------------------------
# Parameter packing (do ONCE outside any time loop)
# ---------------------------------------------------------------------------
def pack_lstm_params(wx, bx, wh, bh):
    """Fuse (Wx, Wh) -> one (K, 4*Hp) matrix with 128-lane-aligned gate blocks and
    (bx, bh) -> one (1, 4*Hp) bias.  Gate order along the padded axis matches
    torch.chunk(4, 1): [in, forget, cell, out]."""
    k_in, four_h = wx.shape
    H = four_h // 4
    Hp = _round_up(H, LANE)

    w = jnp.concatenate([wx, wh], axis=0)                      # (K, 4H)
    b = bx.reshape(1, four_h) + bh.reshape(1, four_h)          # (1, 4H)
    K = w.shape[0]

    w4 = w.reshape(K, 4, H)
    b4 = b.reshape(1, 4, H)
    w_pad = jnp.zeros((K, 4, Hp), w.dtype).at[:, :, :H].set(w4).reshape(K, 4 * Hp)
    b_pad = jnp.zeros((1, 4, Hp), b.dtype).at[:, :, :H].set(b4).reshape(1, 4 * Hp)
    return w_pad, b_pad


# ---------------------------------------------------------------------------
# Wrapper
# ---------------------------------------------------------------------------
@functools.partial(jax.jit, static_argnames=("block_b", "matmul_dtype"))
def lstm_cell_pallas(x, hx, cx, w_pad, b_pad, *, block_b=128, matmul_dtype=None):
    """One LSTM cell step.  Returns (hy, cy), both (B, hidden)."""
    B, H = hx.shape
    K = w_pad.shape[0]
    Hp = b_pad.shape[1] // 4

    # Batch tile: multiple of 8 sublanes, capped at block_b.
    tb = min(_round_up(B, 8), block_b)
    Bp = _round_up(B, tb)

    # Fused LHS [x | hx]; optionally cast only the matmul operands (v6e/v7x bf16).
    z = jnp.concatenate([x, hx], axis=1)                        # (B, K)
    w = w_pad
    if matmul_dtype is not None:
        z = z.astype(matmul_dtype)
        w = w.astype(matmul_dtype)

    # Pad batch to the tile grid and cx to the lane-dense hidden width.
    z_p = jnp.zeros((Bp, K), z.dtype).at[:B, :].set(z)
    cx_p = jnp.zeros((Bp, Hp), cx.dtype).at[:B, :H].set(cx)

    grid = (Bp // tb,)
    out_shape = (
        jax.ShapeDtypeStruct((Bp, Hp), hx.dtype),
        jax.ShapeDtypeStruct((Bp, Hp), cx.dtype),
    )

    hy_p, cy_p = pl.pallas_call(
        _lstm_cell_kernel,
        out_shape=out_shape,
        grid=grid,
        in_specs=[
            pl.BlockSpec((tb, K), lambda i: (i, 0)),            # [x|hx] batch tile
            pl.BlockSpec((tb, Hp), lambda i: (i, 0)),           # cx batch tile
            pl.BlockSpec((K, 4 * Hp), lambda i: (0, 0)),        # fused weights (resident)
            pl.BlockSpec((1, 4 * Hp), lambda i: (0, 0)),        # fused bias (resident)
        ],
        out_specs=(
            pl.BlockSpec((tb, Hp), lambda i: (i, 0)),
            pl.BlockSpec((tb, Hp), lambda i: (i, 0)),
        ),
        compiler_params=pltpu.CompilerParams(
            dimension_semantics=("parallel",),                  # v7x: shard batch over 2 TCs
        ),
    )(z_p, cx_p, w, b_pad)

    # Strip batch/lane padding outside the kernel (keeps in-kernel stores dense).
    return hy_p[:B, :H], cy_p[:B, :H]


# ---------------------------------------------------------------------------
# Pure-JAX reference (matches the PyTorch forward semantics)
# ---------------------------------------------------------------------------
def lstm_cell_ref(x, hx, cx, wx, bx, wh, bh):
    gates = x @ wx + bx + hx @ wh + bh
    i, f, g, o = jnp.split(gates, 4, axis=1)
    i = jax.nn.sigmoid(i)
    f = jax.nn.sigmoid(f)
    g = jnp.tanh(g)
    o = jax.nn.sigmoid(o)
    cy = cx * f + i * g
    hy = o * jnp.tanh(cy)
    return hy, cy


if __name__ == "__main__":
    # Small shapes consistent with the module's forward.
    B = 8
    input_size = 16
    hidden_size = 32

    key = jax.random.PRNGKey(0)
    kx, khx, kcx, kwx, kbx, kwh, kbh = jax.random.split(key, 7)

    std = 1.0 / math.sqrt(hidden_size)  # same init as reset_parameters()
    x  = jax.random.normal(kx,  (B, input_size), dtype=jnp.float32)
    hx = jax.random.normal(khx, (B, hidden_size), dtype=jnp.float32)
    cx = jax.random.normal(kcx, (B, hidden_size), dtype=jnp.float32)

    # PyTorch Linear stores weight as (out_features, in_features); we store the
    # transpose so the kernel can do z @ W directly.
    wx = jax.random.uniform(kwx, (input_size, 4 * hidden_size), jnp.float32, -std, std)
    bx = jax.random.uniform(kbx, (1, 4 * hidden_size), jnp.float32, -std, std)
    wh = jax.random.uniform(kwh, (hidden_size, 4 * hidden_size), jnp.float32, -std, std)
    bh = jax.random.uniform(kbh, (1, 4 * hidden_size), jnp.float32, -std, std)

    # Pack fused / lane-padded parameters ONCE (amortized to zero in a time loop).
    w_pad, b_pad = pack_lstm_params(wx, bx, wh, bh)

    hy, cy = lstm_cell_pallas(x, hx, cx, w_pad, b_pad)
    jax.block_until_ready((hy, cy))

    hy_ref, cy_ref = lstm_cell_ref(x, hx, cx, wx, bx, wh, bh)
    assert jnp.allclose(hy, hy_ref, atol=1e-5, rtol=1e-5), "hy mismatch"
    assert jnp.allclose(cy, cy_ref, atol=1e-5, rtol=1e-5), "cy mismatch"

    print("KERNEL_OK")
</pallas_src>

<mosaic_0001>
module attributes {stable_mosaic.version = 11 : i64} {
  func.func @_lstm_cell_kernel(%arg0: i32, %arg1: memref<8x48xf32, #tpu.memory_space<vmem>>, %arg2: memref<8x128xf32, #tpu.memory_space<vmem>>, %arg3: memref<48x512xf32, #tpu.memory_space<vmem>>, %arg4: memref<1x512xf32, #tpu.memory_space<vmem>>, %arg5: memref<8x128xf32, #tpu.memory_space<vmem>>, %arg6: memref<8x128xf32, #tpu.memory_space<vmem>>) attributes {dimension_semantics = [#tpu.dimension_semantics<parallel>], iteration_bounds = array<i64: 1>, scalar_prefetch = 0 : i64, scratch_operands = 0 : i64, tpu.core_type = #tpu.core_type<tc>, window_params = [{transform_indices = @transform_0, window_bounds = array<i64: 8, 48>}, {transform_indices = @transform_1, window_bounds = array<i64: 8, 128>}, {pipeline_mode = #tpu.pipeline_mode<synchronous>, transform_indices = @transform_2, window_bounds = array<i64: 48, 512>}, {pipeline_mode = #tpu.pipeline_mode<synchronous>, transform_indices = @transform_3, window_bounds = array<i64: 1, 512>}, {transform_indices = @transform_4, window_bounds = array<i64: 8, 128>}, {transform_indices = @transform_5, window_bounds = array<i64: 8, 128>}]} {
    %c0 = arith.constant 0 : index
    %c0_0 = arith.constant 0 : index
    %0 = vector.load %arg1[%c0, %c0_0] : memref<8x48xf32, #tpu.memory_space<vmem>>, vector<8x48xf32>
    %c0_1 = arith.constant 0 : index
    %c0_2 = arith.constant 0 : index
    %1 = vector.load %arg3[%c0_1, %c0_2] : memref<48x512xf32, #tpu.memory_space<vmem>>, vector<48x512xf32>
    %cst = arith.constant dense<0.000000e+00> : vector<8x512xf32>
    %2 = tpu.matmul %0, %1, %cst {dimension_numbers = #tpu.dot_dimension_numbers<[1], [0], [0], [1], [0, 0, 1, 1], [], []>} : vector<8x48xf32>, vector<48x512xf32>, vector<8x512xf32> -> vector<8x512xf32>
    %c0_3 = arith.constant 0 : index
    %c0_4 = arith.constant 0 : index
    %3 = vector.load %arg4[%c0_3, %c0_4] : memref<1x512xf32, #tpu.memory_space<vmem>>, vector<1x512xf32>
    %4 = vector.broadcast %3 : vector<1x512xf32> to vector<8x512xf32>
    %5 = arith.addf %2, %4 : vector<8x512xf32>
    %6 = vector.extract_strided_slice %5 {offsets = [0, 0], sizes = [8, 128], strides = [1, 1]} : vector<8x512xf32> to vector<8x128xf32>
    %7 = arith.negf %6 : vector<8x128xf32>
    %8 = math.exp %7 : vector<8x128xf32>
    %cst_5 = arith.constant 1.000000e+00 : f32
    %9 = vector.broadcast %cst_5 : f32 to vector<8x128xf32>
    %10 = arith.addf %9, %8 : vector<8x128xf32>
    %11 = arith.divf %9, %10 : vector<8x128xf32>
    %12 = vector.extract_strided_slice %5 {offsets = [0, 128], sizes = [8, 128], strides = [1, 1]} : vector<8x512xf32> to vector<8x128xf32>
    %13 = arith.negf %12 : vector<8x128xf32>
    %14 = math.exp %13 : vector<8x128xf32>
    %cst_6 = arith.constant 1.000000e+00 : f32
    %15 = vector.broadcast %cst_6 : f32 to vector<8x128xf32>
    %16 = arith.addf %15, %14 : vector<8x128xf32>
    %17 = arith.divf %15, %16 : vector<8x128xf32>
    %18 = vector.extract_strided_slice %5 {offsets = [0, 256], sizes = [8, 128], strides = [1, 1]} : vector<8x512xf32> to vector<8x128xf32>
    %19 = math.tanh %18 : vector<8x128xf32>
    %20 = vector.extract_strided_slice %5 {offsets = [0, 384], sizes = [8, 128], strides = [1, 1]} : vector<8x512xf32> to vector<8x128xf32>
    %21 = arith.negf %20 : vector<8x128xf32>
    %22 = math.exp %21 : vector<8x128xf32>
    %cst_7 = arith.constant 1.000000e+00 : f32
    %23 = vector.broadcast %cst_7 : f32 to vector<8x128xf32>
    %24 = arith.addf %23, %22 : vector<8x128xf32>
    %25 = arith.divf %23, %24 : vector<8x128xf32>
    %c0_8 = arith.constant 0 : index
    %c0_9 = arith.constant 0 : index
    %26 = vector.load %arg2[%c0_8, %c0_9] : memref<8x128xf32, #tpu.memory_space<vmem>>, vector<8x128xf32>
    %27 = arith.mulf %26, %17 : vector<8x128xf32>
    %28 = arith.mulf %11, %19 : vector<8x128xf32>
    %29 = arith.addf %27, %28 : vector<8x128xf32>
    %30 = math.tanh %29 : vector<8x128xf32>
    %31 = arith.mulf %25, %30 : vector<8x128xf32>
    %c0_10 = arith.constant 0 : index
    %c0_11 = arith.constant 0 : index
    %32 = vector.load %arg6[%c0_10, %c0_11] : memref<8x128xf32, #tpu.memory_space<vmem>>, vector<8x128xf32>
    tpu.vector_store %arg6[%c0_10, %c0_11], %29 {strides = array<i32>} : memref<8x128xf32, #tpu.memory_space<vmem>>, vector<8x128xf32>,
    %c0_12 = arith.constant 0 : index
    %c0_13 = arith.constant 0 : index
    %33 = vector.load %arg5[%c0_12, %c0_13] : memref<8x128xf32, #tpu.memory_space<vmem>>, vector<8x128xf32>
    tpu.vector_store %arg5[%c0_12, %c0_13], %31 {strides = array<i32>} : memref<8x128xf32, #tpu.memory_space<vmem>>, vector<8x128xf32>,
    return
  }
  func.func @transform_0(%arg0: i32) -> (i32, i32) {
    %c0_i32 = arith.constant 0 : i32
    %c0_i32_0 = arith.constant 0 : i32
    return %arg0, %c0_i32 : i32, i32
  }
  func.func @transform_1(%arg0: i32) -> (i32, i32) {
    %c0_i32 = arith.constant 0 : i32
    %c0_i32_0 = arith.constant 0 : i32
    return %arg0, %c0_i32 : i32, i32
  }
  func.func @transform_2(%arg0: i32) -> (i32, i32) {
    %c0_i32 = arith.constant 0 : i32
    %c0_i32_0 = arith.constant 0 : i32
    %c0_i32_1 = arith.constant 0 : i32
    return %c0_i32, %c0_i32_0 : i32, i32
  }
  func.func @transform_3(%arg0: i32) -> (i32, i32) {
    %c0_i32 = arith.constant 0 : i32
    %c0_i32_0 = arith.constant 0 : i32
    %c0_i32_1 = arith.constant 0 : i32
    return %c0_i32, %c0_i32_0 : i32, i32
  }
  func.func @transform_4(%arg0: i32) -> (i32, i32) {
    %c0_i32 = arith.constant 0 : i32
    %c0_i32_0 = arith.constant 0 : i32
    return %arg0, %c0_i32 : i32, i32
  }
  func.func @transform_5(%arg0: i32) -> (i32, i32) {
    %c0_i32 = arith.constant 0 : i32
    %c0_i32_0 = arith.constant 0 : i32
    return %arg0, %c0_i32 : i32, i32
  }
}

</mosaic_0001>

<bundles_post_ra>
// kernel: lstm_cell_pallas.1
= control target key start
LH: loop header
LB: loop body
LE: loop exit
PB: predicated region body
PF: predicated region fallthrough
CT: control target
= control target key end

     0   :  { %11 = vsyncpa [#allocation3], 0  ;;  %s488_s0 = inlined_call_operand.vmem [shape: f32[8,48], index: 0, kind: input, shape index: {}]   ;;  %s489_s1 = inlined_call_operand.vmem [shape: f32[8,128], index: 1, kind: input, shape index: {}]   ;;  %s490_s2 = inlined_call_operand.hbm [shape: f32[48,512], index: 2, kind: input, shape index: {}]   ;;  %s491_s3 = inlined_call_operand.vmem [shape: f32[1,512], index: 3, kind: input, shape index: {}]   ;;  %s492_s4 = inlined_call_operand.hbm [shape: f32[8,128], index: 4, kind: output, shape index: {0}]   ;;  %s493_s5 = inlined_call_operand.hbm [shape: f32[8,128], index: 5, kind: output, shape index: {1}]  }
   0x1   :  { %12 = vsyncpa [#allocation4], 0 }
   0x2   :  { %13 = vsyncpa [#allocation7], 0  ;;  %s407_s18 = smov [#allocation2]   ;;  %s335_s22 = scalar_lea.hbm %s490_s2, 3072 }
   0x3   :  { %s23_s19 = sshll.u32 %s407_s18, 4  ;;  %p336_p0 = scmp.ne.s32.totalorder %s490_s2, %s335_s22  ;;  %s24_s19 = int_to_ptr.vmem [resolvable:$true] %s23_s19 }
   0x4   :  { %p339_p1 = scmp.lt.u32.totalorder %s335_s22, %s490_s2 }
   0x6   :  { %p341_p2 = pnand %p339_p1, %p336_p0 }
   0x8   :  { %344 = shalt.err (!%p341_p2)
}
   0x9   :  { %s345_s27 = scalar_lea.vmem %s24_s19, 3072  ;;  %p350_p4 = scmp.lt.s32.totalorder %s24_s19, %s24_s19 }
   0xa   :  { %p346_p3 = scmp.ne.s32.totalorder %s24_s19, %s345_s27  ;;  %p351_p5 = scmp.lt.s32.totalorder %s345_s27, %s345_s27 }
   0xc   :  { %p352_p6 = por %p351_p5, %p350_p4 }
   0xe   :  { %p353_p7 = pnand %p352_p6, %p346_p3 }
  0x10   :  { %356 = shalt.err (!%p353_p7)
}
  0x11   :  { %s408_s28 = smov 512   ;;  %s409_s29 = smov 32  }
  0x12   :  { %29 = dma.hbm_to_vmem [thread:$0]  %s490_s2, 3072, %s24_s19, [#allocation3], %s408_s28, %s408_s28, %s409_s29  }
  0x13   :  { %401 = dma.done.wait [#allocation3], 3072  }
  0x14   :  { %402 = vsyncadd [#allocation3], 4294964224  ;;  %v410_v0 = vmov 0.0   ;;  %v37_v1 = vld [vmem:[#allocation2 + $0x8] sm:$0xff]  ;;  %v36_v3 = vld [vmem:[#allocation2] sm:$0xff]  ;;  %vm82_vm0 = vcmask 392192   ;;  %v62_v38 = vlaneseq }
  0x15   :  { %150 = vmatprep.mubr.f32.mxu0 %v410_v0  ;;  %221 = vmatprep.mubr.f32.mxu1 %v410_v0  ;;  %v41_v2 = vld [vmem:[#allocation2 + $0x28] sm:$0xff]  ;;  %v40_v5 = vld [vmem:[#allocation2 + $0x20] sm:$0xff]  ;;  %v39_v17 = vld [vmem:[#allocation2 + $0x18] sm:$0xff]  ;;  %s411_s10 = smov [#allocation6]  }
  0x16   :  { %v289_v4 = vpack.c.bf16 %v41_v2, %v37_v1  ;;  %v45_v6 = vld [vmem:[#allocation2 + $0x48] sm:$0xff]  ;;  %v291_v8 = vpack.c.bf16 %v40_v5, %v36_v3  ;;  %v44_v10 = vld [vmem:[#allocation2 + $0x40] sm:$0xff]  ;;  %v43_v18 = vld [vmem:[#allocation2 + $0x38] sm:$0xff]  ;;  %v63_v39 = vshrl.u32 %v62_v38, 7  ;;  %s271_s11 = sshll.u32 %s411_s10, 4  ;;  %s272_s11 = int_to_ptr.vmem [resolvable:$true] %s271_s11 }
  0x17   :  { %v49_v7 = vld [vmem:[#allocation2 + $0x68] sm:$0xff]  ;;  %v48_v11 = vld [vmem:[#allocation2 + $0x60] sm:$0xff]  ;;  %v301_v20 = vpack.c.bf16 %v43_v18, %v39_v17  ;;  %v38_v21 = vld [vmem:[#allocation2 + $0x10] sm:$0xff]  ;;  %s357_s12 = scalar_lea.vmem %s272_s11, 128  ;;  %p362_p9 = scmp.lt.s32.totalorder %s272_s11, %s272_s11 }
  0x18   :  { %v293_v9 = vpack.c.bf16 %v49_v7, %v45_v6  ;;  %v53_v12 = vld [vmem:[#allocation2 + $0x88] sm:$0xff]  ;;  %290 = vmatprep.subr.bf16.mxu0 %v289_v4  ;;  %v52_v14 = vld [vmem:[#allocation2 + $0x80] sm:$0xff]  ;;  %v295_v15 = vpack.c.bf16 %v48_v11, %v44_v10  ;;  %v42_v22 = vld [vmem:[#allocation2 + $0x30] sm:$0xff]  ;;  %v64_v40 = vsub.s32 0, %v63_v39  ;;  %v68_v42 = vsub.s32 1, %v63_v39  ;;  %p358_p8 = scmp.ne.s32.totalorder %s272_s11, %s357_s12  ;;  %p363_p10 = scmp.lt.s32.totalorder %s357_s12, %s357_s12 }
  0x19   :  { %v57_v13 = vld [vmem:[#allocation2 + $0xa8] sm:$0xff]  ;;  %292 = vmatpush1.bf16.msra.mxu0 %v291_v8  ;;  %v56_v16 = vld [vmem:[#allocation2 + $0xa0] sm:$0xff]  ;;  %v47_v23 = vld [vmem:[#allocation2 + $0x58] sm:$0xff]  ;;  %v303_v24 = vpack.c.bf16 %v42_v22, %v38_v21  ;;  %302 = vmatprep.subr.bf16.mxu1 %v301_v20  ;;  %v76_v45 = vsub.s32 3, %v63_v39  ;;  %v72_v53 = vsub.s32 2, %v63_v39 }
  0x1a   :  { %294 = vmatprep.subr.bf16.mxu0 %v293_v9  ;;  %v297_v19 = vpack.c.bf16 %v57_v13, %v53_v12  ;;  %v51_v25 = vld [vmem:[#allocation2 + $0x78] sm:$0xff]  ;;  %v46_v26 = vld [vmem:[#allocation2 + $0x50] sm:$0xff]  ;;  %v299_v31 = vpack.c.bf16 %v56_v16, %v52_v14  ;;  %v35_v36 = vld [vmem:[%s488_s0] sm:$0xff]  ;;  %p364_p11 = por %p363_p10, %p362_p9 }
  0x1b   :  { %v50_v27 = vld [vmem:[#allocation2 + $0x70] sm:$0xff]  ;;  %v305_v28 = vpack.c.bf16 %v51_v25, %v47_v23  ;;  %v55_v29 = vld [vmem:[#allocation2 + $0x98] sm:$0xff]  ;;  %304 = vmatpush1.bf16.msra.mxu1 %v303_v24  ;;  %v60_v41 = vld [vmem:[%s491_s3] sm:$0xf] }
  0x1c   :  { %v59_v30 = vld [vmem:[#allocation2 + $0xb8] sm:$0xff]  ;;  %v307_v32 = vpack.c.bf16 %v50_v27, %v46_v26  ;;  %v54_v34 = vld [vmem:[#allocation2 + $0x90] sm:$0xff]  ;;  %v65_v43 = vrot.slane %v60_v41, %v64_v40  ;;  %v69_v44 = vrot.slane %v60_v41, %v68_v42  ;;  %v77_v51 = vrot.slane %v60_v41, %v76_v45  ;;  %v247_v2 = vld [vmem:[%s489_s1] sm:$0xff]  ;;  %p365_p12 = pnand %p364_p11, %p358_p8 }
  0x1d   :  { %296 = vmatpush1.bf16.msra.mxu0 %v295_v15  ;;  %306 = vmatprep.subr.bf16.mxu1 %v305_v28  ;;  %v309_v33 = vpack.c.bf16 %v59_v30, %v55_v29  ;;  %v58_v35 = vld [vmem:[#allocation2 + $0xb0] sm:$0xff]  ;;  %v73_v57 = vrot.slane %v60_v41, %v72_v53 }
  0x1e   :  { %298 = vmatprep.subr.bf16.mxu0 %v297_v19  ;;  %v311_v37 = vpack.c.bf16 %v58_v35, %v54_v34 }
  0x1f   :  { %308 = vmatpush1.bf16.msra.mxu1 %v307_v32 }
  0x20   :  { %310 = vmatprep.subr.bf16.mxu1 %v309_v33 }
  0x21   :  { %300 = vmatpush1.bf16.msra.mxu0 %v299_v31 }
  0x23   :  { %312 = vmatpush1.bf16.msra.mxu1 %v311_v37 }
  0x24   :  { %284 = vmatmul.mubr.msk.f32.vlgmr.msra.gmra.mrb[0].mxu0 %vm82_vm0, %v35_v36 }
  0x26   :  { %285 = vmatmul.mubr.msk.f32.vlgmr.msra.gmra.mrb[0].mxu1 %vm82_vm0, %v35_v36 }
  0xf7   :  { %v152_v46 = vpop.f32.mrb[0].mxu0 }
  0xf8   :  { %v153_v47 = vadd.f32 %v152_v46, %v65_v43  ;;  %v154_v48 = vpop.f32.mrb[1].mxu0 }
  0xf9   :  { %v155_v49 = vadd.f32 %v154_v48, %v69_v44  ;;  %v223_v54 = vpop.f32.mrb[0].mxu1 }
  0xfa   :  { %v286_v50 = vmul.f32 -1.442695, %v153_v47  ;;  %v225_v55 = vpop.f32.mrb[1].mxu1  ;;  %v224_v59 = vadd.f32 %v223_v54, %v73_v57 }
  0xfb   :  { %v287_v52 = vmul.f32 -1.442695, %v155_v49  ;;  %v226_v56 = vadd.f32 %v225_v55, %v77_v51 }
  0xfc   :  { %319 = vpow2.f32 %v286_v50 }
  0xfd   :  { %321 = vpow2.f32 %v287_v52  ;;  %v288_v58 = vmul.f32 -1.442695, %v226_v56 }
  0xff   :  { %323 = vpow2.f32 %v288_v58 }
 0x100   :  { %325 = vtanh.f32 %v224_v59 }
 0x106   :  { %v320_v60 = vpop.eup %319 }
 0x107   :  { %v322_v61 = vpop.eup %321  ;;  %v231_v62 = vadd.f32 1.0, %v320_v60 }
 0x108   :  { %v237_v63 = vadd.f32 1.0, %v322_v61 }
 0x109   :  { %327 = vrcp.f32 %v231_v62  ;;  %v324_v0 = vpop.eup %323 }
 0x10a   :  { %329 = vrcp.f32 %v237_v63  ;;  %v326_v1 = vpop.eup %325  ;;  %v244_v4 = vadd.f32 1.0, %v324_v0 }
 0x10c   :  { %331 = vrcp.f32 %v244_v4 }
 0x113   :  { %v328_v3 = vpop.eup %327 }
 0x114   :  { %v330_v5 = vpop.eup %329  ;;  %v249_v6 = vmul.f32 %v328_v3, %v326_v1 }
 0x115   :  { %v248_v7 = vmul.f32 %v330_v5, %v247_v2 }
 0x117   :  { %v250_v8 = vadd.f32 %v249_v6, %v248_v7 }
 0x119   :  { %253 = vst [vmem:[#allocation6] sm:$0xff] %v250_v8  ;;  %333 = vtanh.f32 %v250_v8 }
 0x11a   :  { %368 = shalt.err (!%p365_p12)
}
 0x11b   :  { %s369_s14 = scalar_lea.hbm %s493_s5, 128 }
 0x11c   :  { %p370_p13 = scmp.ne.s32.totalorder %s493_s5, %s369_s14  ;;  %p373_p0 = scmp.lt.u32.totalorder %s369_s14, %s493_s5 }
 0x11e   :  { %p375_p1 = pnand %p373_p0, %p370_p13 }
 0x120   :  { %378 = shalt.err (!%p375_p1)
}
 0x121   :  { %274 = dma.vmem_to_hbm [thread:$0]  %s272_s11, 128, %s493_s5, [#allocation7]   ;;  %v332_v9 = vpop.eup %331 }
 0x122   :  { %s412_s21 = smov [#allocation5]  }
 0x123   :  { %s261_s22 = sshll.u32 %s412_s21, 4  ;;  %v334_v10 = vpop.eup %333  ;;  %s262_s22 = int_to_ptr.vmem [resolvable:$true] %s261_s22 }
 0x124   :  { %v252_v11 = vmul.f32 %v334_v10, %v332_v9  ;;  %s379_s23 = scalar_lea.vmem %s262_s22, 128  ;;  %p384_p3 = scmp.lt.s32.totalorder %s262_s22, %s262_s22 }
 0x125   :  { %p380_p2 = scmp.ne.s32.totalorder %s262_s22, %s379_s23  ;;  %p385_p4 = scmp.lt.s32.totalorder %s379_s23, %s379_s23 }
 0x126   :  { %254 = vst [vmem:[#allocation5] sm:$0xff] %v252_v11 }
 0x127   :  { %p386_p5 = por %p385_p4, %p384_p3 }
 0x129   :  { %p387_p6 = pnand %p386_p5, %p380_p2 }
 0x12b   :  { %390 = shalt.err (!%p387_p6)
}
 0x12c   :  { %s391_s26 = scalar_lea.hbm %s492_s4, 128 }
 0x12d   :  { %p392_p7 = scmp.ne.s32.totalorder %s492_s4, %s391_s26  ;;  %p395_p8 = scmp.lt.u32.totalorder %s391_s26, %s492_s4 }
 0x12f   :  { %p397_p9 = pnand %p395_p8, %p392_p7 }
 0x131   :  { %400 = shalt.err (!%p397_p9)
}
 0x132   :  { %264 = dma.vmem_to_hbm [thread:$0]  %s262_s22, 128, %s492_s4, [#allocation4]  }
 0x133   :  { %403 = dma.done.wait [#allocation4], 128  }
 0x134   :  { %404 = vsyncadd [#allocation4], 4294967168 }
 0x135   :  { %405 = dma.done.wait [#allocation7], 128  }
 0x136   :  { %406 = vsyncadd [#allocation7], 4294967168 }
 0x137   :  { %281 = vsyncpa [#allocation3], 1 }
 0x138   :  { %282 = vsyncpa [#allocation4], 1 }
 0x139   :  { %283 = vsyncpa [#allocation7], 1 }

</bundles_post_ra>
